<compile_context>
chip_gen: v6e
topology: v6e:2x2x1
jax: 0.10.0
libtpu: 0.0.40
codegen_flags: <defaults>
</compile_context>

<pallas_src>
import functools

import jax
import jax.numpy as jnp
from jax.experimental import pallas as pl
from jax.experimental.pallas import tpu as pltpu

_BN_EPS = 1e-5


def _round_up(n, m):
  return ((n + m - 1) // m) * m


def _cdiv(a, b):
  return (a + b - 1) // b


def _layer_dims(shape_features_size, nb_views):
  """Static dims of the 5 linear layers (true and 128-lane padded)."""
  F, nv = shape_features_size, nb_views
  ins = [F, F, F, 5 * nv, 2 * nv]
  outs = [F, F, 5 * nv, 2 * nv, 2 * nv]
  pouts = [_round_up(o, 128) for o in outs]
  pins = [_round_up(F, 128)] + pouts[:4]       # x itself is lane-padded to 128
  offs = [0]
  for p in pouts[:-1]:
    offs.append(offs[-1] + p)
  return ins, outs, pins, pouts, offs


def init_raw_params(key, shape_features_size, nb_views):
  """Unfolded f32 parameters mirroring the PyTorch module (eval mode).

  Layers 0..3: Linear + BatchNorm1d (running stats) + ReLU.
  Layer 4:     plain Linear (Tanh applied in the forward).
  Non-identity BN statistics are generated so the fold is actually exercised.
  """
  ins, outs, _, _, _ = _layer_dims(shape_features_size, nb_views)
  raw = []
  keys = jax.random.split(key, 6 * len(ins))
  for li in range(5):
    fin, fout = ins[li], outs[li]
    k = keys[6 * li:6 * (li + 1)]
    layer = dict(
        w=jax.random.normal(k[0], (fin, fout), jnp.float32) / jnp.sqrt(fin),
        b=0.05 * jax.random.normal(k[1], (fout,), jnp.float32))
    if li < 4:
      layer.update(
          gamma=jax.random.uniform(k[2], (fout,), jnp.float32, 0.8, 1.2),
          beta=0.1 * jax.random.normal(k[3], (fout,), jnp.float32),
          mean=0.1 * jax.random.normal(k[4], (fout,), jnp.float32),
          var=jax.random.uniform(k[5], (fout,), jnp.float32, 0.5, 1.5))
    raw.append(layer)
  return raw


def fold_and_pack_params(raw, shape_features_size, nb_views, *,
                         matmul_dtype=jnp.bfloat16):
  """Fold eval-mode BatchNorm into the weights and pack into kernel slabs.

  Returns dict with:
    w_slab: (max(pins), sum(pouts)) matmul_dtype — all 5 padded weight
            matrices concatenated along lanes; one resident DMA per call.
    vecs:   (8, W) f32 — rows 0..4 folded shift / bias per layer, row 5 the
            output scale (180 | 89.9 | 0), rows 6..7 padding.
  """
  ins, outs, pins, pouts, offs = _layer_dims(shape_features_size, nb_views)
  nv = nb_views
  R, C, W = max(pins), sum(pouts), max(pouts)
  slab = jnp.zeros((R, C), jnp.float32)
  vec_rows = []
  for li in range(5):
    w, b = raw[li]["w"], raw[li]["b"]
    if li < 4:
      s = raw[li]["gamma"] / jnp.sqrt(raw[li]["var"] + _BN_EPS)
      w = w * s                                  # fold BN scale into columns
      t = (b - raw[li]["mean"]) * s + raw[li]["beta"]
    else:
      t = b
    slab = slab.at[:ins[li], offs[li]:offs[li] + outs[li]].set(w)
    vec_rows.append(jnp.zeros((W,), jnp.float32).at[:outs[li]].set(t))
  scale = (jnp.zeros((W,), jnp.float32)
           .at[:nv].set(180.0).at[nv:2 * nv].set(89.9))
  # views_azim / views_elev buffers are zeros in the module, so no base add.
  # TODO(synk): if a checkpoint carries non-zero azim/elev buffers, add them
  # back as an extra vecs row + a single epilogue add.
  vec_rows += [scale, jnp.zeros((W,), jnp.float32), jnp.zeros((W,), jnp.float32)]
  return {"w_slab": slab.astype(matmul_dtype),
          "vecs": jnp.stack(vec_rows, axis=0)}


def _make_selector_kernel(pins, pouts, offs):
  """pins/pouts/offs: static padded dims + lane offsets of each layer."""
  d5p = pouts[-1]

  def kernel(x_ref, w_ref, vecs_ref, out_ref):
    h = x_ref[...]                               # (tb, Fp), matmul dtype
    for li in range(5):
      pin, pout, off = pins[li], pouts[li], offs[li]
      w = w_ref[0:pin, off:off + pout]           # static slab view (1 tile)
      y = jnp.dot(h.astype(w.dtype), w, preferred_element_type=jnp.float32)
      y = y + vecs_ref[li:li + 1, 0:pout]        # folded BN shift / bias
      h = jnp.maximum(y, 0.0) if li < 4 else y
    # Lane-dense fused epilogue: tanh * (180 | 89.9 | 0); azim/elev buffers
    # are zeros so there is no base add.
    out_ref[...] = jnp.tanh(h) * vecs_ref[5:6, 0:d5p]

  return kernel


@functools.partial(jax.jit, static_argnames=("nb_views", "canonical_elevation",
                                             "canonical_distance", "tile_b"))
def learned_direct_view_selector(shape_features, params, *, nb_views=12,
                                 canonical_elevation=35.0,
                                 canonical_distance=2.2, tile_b=512):
  """Returns (azimuths, elevations, distances), each (B, nb_views) f32.

  canonical_elevation is accepted for interface parity with the PyTorch
  module; the module's views_elev buffer is torch.zeros so it is unused.
  """
  del canonical_elevation
  B, F = shape_features.shape
  nv = nb_views
  _, _, pins, pouts, offs = _layer_dims(F, nv)
  Fp, d5p = pins[0], pouts[-1]
  w_slab, vecs = params["w_slab"], params["vecs"]
  assert w_slab.shape == (max(pins), sum(pouts)), "w_slab shape mismatch"
  matmul_dtype = w_slab.dtype

  # Batch tiling: a multiple of 16 sublanes (full bf16 input / f32 output
  # vregs), aiming for >= 2 grid steps when B allows (v7x megacore), capped at
  # tile_b (v5e/v6e DMA-size sweet spot). Tiny batches are zero-padded rather
  # than emitting ragged blocks.
  b16 = _round_up(B, 16)
  tile_b_eff = max(16, min(tile_b, _round_up(_cdiv(b16, 2), 16)))
  b_pad = _round_up(B, tile_b_eff)
  grid = (b_pad // tile_b_eff,)

  x = jnp.pad(shape_features,
              ((0, b_pad - B), (0, Fp - F))).astype(matmul_dtype)

  itemsize = lambda a: jnp.dtype(a.dtype).itemsize
  flops = 2 * b_pad * sum(pins[l] * pouts[l] for l in range(5))
  bytes_accessed = (x.size * itemsize(x) + b_pad * d5p * 4
                    + w_slab.size * itemsize(w_slab) + vecs.size * 4)

  out_padded = pl.pallas_call(
      _make_selector_kernel(tuple(pins), tuple(pouts), tuple(offs)),
      out_shape=jax.ShapeDtypeStruct((b_pad, d5p), jnp.float32),
      grid=grid,
      in_specs=[
          pl.BlockSpec((tile_b_eff, Fp), lambda i: (i, 0)),   # batch-tiled x
          pl.BlockSpec(w_slab.shape, lambda i: (0, 0)),       # resident slab
          pl.BlockSpec(vecs.shape, lambda i: (0, 0)),         # resident vecs
      ],
      out_specs=pl.BlockSpec((tile_b_eff, d5p), lambda i: (i, 0)),
      compiler_params=pltpu.CompilerParams(
          dimension_semantics=("parallel",),                  # megacore-ready
          vmem_limit_bytes=32 * 1024 * 1024),
      cost_estimate=pl.CostEstimate(
          flops=flops, transcendentals=b_pad * d5p,
          bytes_accessed=bytes_accessed),
  )(x, w_slab, vecs)

  azim = out_padded[:B, :nv]
  elev = out_padded[:B, nv:2 * nv]
  dist = jnp.full((B, nv), canonical_distance, jnp.float32)  # constant buffer
  return azim, elev, dist


def _reference_module(shape_features, raw, nb_views, canonical_distance):
  """Unfused f32 reference mirroring the PyTorch module in eval mode:
  (Linear -> BatchNorm1d(running stats) -> ReLU) x4, Linear, Tanh, chunk."""
  hp = jax.lax.Precision.HIGHEST
  h = shape_features
  for li in range(4):
    p = raw[li]
    z = jnp.dot(h, p["w"], precision=hp) + p["b"]
    z = (z - p["mean"]) * (p["gamma"] / jnp.sqrt(p["var"] + _BN_EPS)) + p["beta"]
    h = jnp.maximum(z, 0.0)
  y = jnp.tanh(jnp.dot(h, raw[4]["w"], precision=hp) + raw[4]["b"])
  nv = nb_views
  dist = jnp.full((shape_features.shape[0], nv), canonical_distance, jnp.float32)
  return y[:, :nv] * 180.0, y[:, nv:2 * nv] * 89.9, dist


def _reference_folded(shape_features, params, nb_views, canonical_distance, *,
                      precision=None):
  """Pure-JAX replica of the kernel math on the folded / padded params."""
  B, F = shape_features.shape
  nv = nb_views
  _, _, pins, pouts, offs = _layer_dims(F, nv)
  w_slab, vecs = params["w_slab"], params["vecs"]
  mdt = w_slab.dtype
  h = jnp.pad(shape_features, ((0, 0), (0, pins[0] - F))).astype(mdt)
  for li in range(5):
    w = w_slab[:pins[li], offs[li]:offs[li] + pouts[li]]
    y = jnp.dot(h.astype(mdt), w, preferred_element_type=jnp.float32,
                precision=precision)
    y = y + vecs[li, :pouts[li]]
    h = jnp.maximum(y, 0.0) if li < 4 else y
  y = jnp.tanh(h) * vecs[5, :pouts[-1]]
  dist = jnp.full((B, nv), canonical_distance, jnp.float32)
  return y[:, :nv], y[:, nv:2 * nv], dist


if __name__ == "__main__":
  # Small shapes consistent with the module's forward:
  #   shape_features: (batch, shape_features_size); nb_views views.
  batch = 2
  shape_features_size = 64
  nb_views = 12
  canonical_distance = 2.2

  key = jax.random.PRNGKey(0)
  k_feat, k_params = jax.random.split(key)
  shape_features = jax.random.normal(
      k_feat, (batch, shape_features_size), jnp.float32)

  raw = init_raw_params(k_params, shape_features_size, nb_views)
  params_f32 = fold_and_pack_params(raw, shape_features_size, nb_views,
                                    matmul_dtype=jnp.float32)
  params = fold_and_pack_params(raw, shape_features_size, nb_views,
                                matmul_dtype=jnp.bfloat16)

  azim, elev, dist = learned_direct_view_selector(
      shape_features, params, nb_views=nb_views,
      canonical_distance=canonical_distance)
  jax.block_until_ready((azim, elev, dist))
  assert azim.shape == (batch, nb_views)
  assert elev.shape == (batch, nb_views)
  assert dist.shape == (batch, nb_views)

  # Check A — BN folding + lane padding vs. the UNFUSED module semantics
  # (Linear + BN(running stats) + ReLU), both in f32 at HIGHEST matmul
  # precision: validates the fold algebra with non-identity running stats.
  fa, fe, _ = _reference_folded(shape_features, params_f32, nb_views,
                                canonical_distance,
                                precision=jax.lax.Precision.HIGHEST)
  ma, me, _ = _reference_module(shape_features, raw, nb_views,
                                canonical_distance)
  assert jnp.allclose(fa, ma, atol=1e-2), "BN-fold azimuth mismatch"
  assert jnp.allclose(fe, me, atol=1e-2), "BN-fold elevation mismatch"

  # Check B — Pallas kernel vs. a pure-JAX replica using the identical folded
  # bf16 params: remaining deltas are accumulation order and the Mosaic tanh
  # approximation at outputs scaled up to ~180 degrees, hence atol=5e-2.
  ra, re, rd = _reference_folded(shape_features, params, nb_views,
                                 canonical_distance)
  assert jnp.allclose(azim, ra, atol=5e-2), "azimuth mismatch"
  assert jnp.allclose(elev, re, atol=5e-2), "elevation mismatch"
  assert jnp.allclose(dist, rd, atol=1e-6), "distance mismatch"
  assert jnp.allclose(dist, canonical_distance), "distance value mismatch"

  print("KERNEL_OK")
</pallas_src>

<mosaic_0001>
module attributes {stable_mosaic.version = 11 : i64} {
  func.func @kernel(%arg0: i32, %arg1: memref<16x128xbf16, #tpu.memory_space<vmem>>, %arg2: memref<128x640xbf16, #tpu.memory_space<vmem>>, %arg3: memref<8x128xf32, #tpu.memory_space<vmem>>, %arg4: memref<16x128xf32, #tpu.memory_space<vmem>>) attributes {dimension_semantics = [#tpu.dimension_semantics<parallel>], iteration_bounds = array<i64: 1>, scalar_prefetch = 0 : i64, scratch_operands = 0 : i64, tpu.core_type = #tpu.core_type<tc>, window_params = [{transform_indices = @transform_0, window_bounds = array<i64: 16, 128>}, {pipeline_mode = #tpu.pipeline_mode<synchronous>, transform_indices = @transform_1, window_bounds = array<i64: 128, 640>}, {pipeline_mode = #tpu.pipeline_mode<synchronous>, transform_indices = @transform_2, window_bounds = array<i64: 8, 128>}, {transform_indices = @transform_3, window_bounds = array<i64: 16, 128>}]} {
    %c0 = arith.constant 0 : index
    %c0_0 = arith.constant 0 : index
    %0 = vector.load %arg1[%c0, %c0_0] : memref<16x128xbf16, #tpu.memory_space<vmem>>, vector<16x128xbf16>
    %c0_1 = arith.constant 0 : index
    %c0_2 = arith.constant 0 : index
    %1 = vector.load %arg2[%c0_1, %c0_2] : memref<128x640xbf16, #tpu.memory_space<vmem>>, vector<128x128xbf16>
    %cst = arith.constant dense<0.000000e+00> : vector<16x128xf32>
    %2 = tpu.matmul %0, %1, %cst {dimension_numbers = #tpu.dot_dimension_numbers<[1], [0], [0], [1], [0, 0, 1, 1], [], []>} : vector<16x128xbf16>, vector<128x128xbf16>, vector<16x128xf32> -> vector<16x128xf32>
    %c0_3 = arith.constant 0 : index
    %c0_4 = arith.constant 0 : index
    %3 = vector.load %arg3[%c0_3, %c0_4] : memref<8x128xf32, #tpu.memory_space<vmem>>, vector<1x128xf32>
    %4 = vector.broadcast %3 : vector<1x128xf32> to vector<16x128xf32>
    %5 = arith.addf %2, %4 : vector<16x128xf32>
    %cst_5 = arith.constant 0.000000e+00 : f32
    %6 = vector.broadcast %cst_5 : f32 to vector<16x128xf32>
    %7 = arith.maximumf %5, %6 : vector<16x128xf32>
    %c0_6 = arith.constant 0 : index
    %c128 = arith.constant 128 : index
    %8 = vector.load %arg2[%c0_6, %c128] : memref<128x640xbf16, #tpu.memory_space<vmem>>, vector<128x128xbf16>
    %9 = arith.truncf %7 : vector<16x128xf32> to vector<16x128xbf16>
    %cst_7 = arith.constant dense<0.000000e+00> : vector<16x128xf32>
    %10 = tpu.matmul %9, %8, %cst_7 {dimension_numbers = #tpu.dot_dimension_numbers<[1], [0], [0], [1], [0, 0, 1, 1], [], []>} : vector<16x128xbf16>, vector<128x128xbf16>, vector<16x128xf32> -> vector<16x128xf32>
    %c1 = arith.constant 1 : index
    %c0_8 = arith.constant 0 : index
    %11 = vector.load %arg3[%c1, %c0_8] : memref<8x128xf32, #tpu.memory_space<vmem>>, vector<1x128xf32>
    %12 = vector.broadcast %11 : vector<1x128xf32> to vector<16x128xf32>
    %13 = arith.addf %10, %12 : vector<16x128xf32>
    %cst_9 = arith.constant 0.000000e+00 : f32
    %14 = vector.broadcast %cst_9 : f32 to vector<16x128xf32>
    %15 = arith.maximumf %13, %14 : vector<16x128xf32>
    %c0_10 = arith.constant 0 : index
    %c256 = arith.constant 256 : index
    %16 = vector.load %arg2[%c0_10, %c256] : memref<128x640xbf16, #tpu.memory_space<vmem>>, vector<128x128xbf16>
    %17 = arith.truncf %15 : vector<16x128xf32> to vector<16x128xbf16>
    %cst_11 = arith.constant dense<0.000000e+00> : vector<16x128xf32>
    %18 = tpu.matmul %17, %16, %cst_11 {dimension_numbers = #tpu.dot_dimension_numbers<[1], [0], [0], [1], [0, 0, 1, 1], [], []>} : vector<16x128xbf16>, vector<128x128xbf16>, vector<16x128xf32> -> vector<16x128xf32>
    %c2 = arith.constant 2 : index
    %c0_12 = arith.constant 0 : index
    %19 = vector.load %arg3[%c2, %c0_12] : memref<8x128xf32, #tpu.memory_space<vmem>>, vector<1x128xf32>
    %20 = vector.broadcast %19 : vector<1x128xf32> to vector<16x128xf32>
    %21 = arith.addf %18, %20 : vector<16x128xf32>
    %cst_13 = arith.constant 0.000000e+00 : f32
    %22 = vector.broadcast %cst_13 : f32 to vector<16x128xf32>
    %23 = arith.maximumf %21, %22 : vector<16x128xf32>
    %c0_14 = arith.constant 0 : index
    %c384 = arith.constant 384 : index
    %24 = vector.load %arg2[%c0_14, %c384] : memref<128x640xbf16, #tpu.memory_space<vmem>>, vector<128x128xbf16>
    %25 = arith.truncf %23 : vector<16x128xf32> to vector<16x128xbf16>
    %cst_15 = arith.constant dense<0.000000e+00> : vector<16x128xf32>
    %26 = tpu.matmul %25, %24, %cst_15 {dimension_numbers = #tpu.dot_dimension_numbers<[1], [0], [0], [1], [0, 0, 1, 1], [], []>} : vector<16x128xbf16>, vector<128x128xbf16>, vector<16x128xf32> -> vector<16x128xf32>
    %c3 = arith.constant 3 : index
    %c0_16 = arith.constant 0 : index
    %27 = vector.load %arg3[%c3, %c0_16] : memref<8x128xf32, #tpu.memory_space<vmem>>, vector<1x128xf32>
    %28 = vector.broadcast %27 : vector<1x128xf32> to vector<16x128xf32>
    %29 = arith.addf %26, %28 : vector<16x128xf32>
    %cst_17 = arith.constant 0.000000e+00 : f32
    %30 = vector.broadcast %cst_17 : f32 to vector<16x128xf32>
    %31 = arith.maximumf %29, %30 : vector<16x128xf32>
    %c0_18 = arith.constant 0 : index
    %c512 = arith.constant 512 : index
    %32 = vector.load %arg2[%c0_18, %c512] : memref<128x640xbf16, #tpu.memory_space<vmem>>, vector<128x128xbf16>
    %33 = arith.truncf %31 : vector<16x128xf32> to vector<16x128xbf16>
    %cst_19 = arith.constant dense<0.000000e+00> : vector<16x128xf32>
    %34 = tpu.matmul %33, %32, %cst_19 {dimension_numbers = #tpu.dot_dimension_numbers<[1], [0], [0], [1], [0, 0, 1, 1], [], []>} : vector<16x128xbf16>, vector<128x128xbf16>, vector<16x128xf32> -> vector<16x128xf32>
    %c4 = arith.constant 4 : index
    %c0_20 = arith.constant 0 : index
    %35 = vector.load %arg3[%c4, %c0_20] : memref<8x128xf32, #tpu.memory_space<vmem>>, vector<1x128xf32>
    %36 = vector.broadcast %35 : vector<1x128xf32> to vector<16x128xf32>
    %37 = arith.addf %34, %36 : vector<16x128xf32>
    %38 = math.tanh %37 : vector<16x128xf32>
    %c5 = arith.constant 5 : index
    %c0_21 = arith.constant 0 : index
    %39 = vector.load %arg3[%c5, %c0_21] : memref<8x128xf32, #tpu.memory_space<vmem>>, vector<1x128xf32>
    %40 = vector.broadcast %39 : vector<1x128xf32> to vector<16x128xf32>
    %41 = arith.mulf %38, %40 : vector<16x128xf32>
    %c0_22 = arith.constant 0 : index
    %c0_23 = arith.constant 0 : index
    %42 = vector.load %arg4[%c0_22, %c0_23] : memref<16x128xf32, #tpu.memory_space<vmem>>, vector<16x128xf32>
    tpu.vector_store %arg4[%c0_22, %c0_23], %41 {strides = array<i32>} : memref<16x128xf32, #tpu.memory_space<vmem>>, vector<16x128xf32>,
    return
  }
  func.func @transform_0(%arg0: i32) -> (i32, i32) {
    %c0_i32 = arith.constant 0 : i32
    %c0_i32_0 = arith.constant 0 : i32
    return %arg0, %c0_i32 : i32, i32
  }
  func.func @transform_1(%arg0: i32) -> (i32, i32) {
    %c0_i32 = arith.constant 0 : i32
    %c0_i32_0 = arith.constant 0 : i32
    %c0_i32_1 = arith.constant 0 : i32
    return %c0_i32, %c0_i32_0 : i32, i32
  }
  func.func @transform_2(%arg0: i32) -> (i32, i32) {
    %c0_i32 = arith.constant 0 : i32
    %c0_i32_0 = arith.constant 0 : i32
    %c0_i32_1 = arith.constant 0 : i32
    return %c0_i32, %c0_i32_0 : i32, i32
  }
  func.func @transform_3(%arg0: i32) -> (i32, i32) {
    %c0_i32 = arith.constant 0 : i32
    %c0_i32_0 = arith.constant 0 : i32
    return %arg0, %c0_i32 : i32, i32
  }
}

</mosaic_0001>

<bundles_post_ra>
// kernel: learned_direct_view_selector.1
= control target key start
LH: loop header
LB: loop body
LE: loop exit
PB: predicated region body
PF: predicated region fallthrough
CT: control target
= control target key end

     0   :  { %8 = vsyncpa [#allocation3], 0  ;;  %s879_s12 = smov [#allocation2]   ;;  %s984_s0 = inlined_call_operand.vmem [shape: bf16[16,128], index: 0, kind: input, shape index: {}]   ;;  %s985_s1 = inlined_call_operand.hbm [shape: bf16[128,640], index: 1, kind: input, shape index: {}]   ;;  %s986_s2 = inlined_call_operand.vmem [shape: f32[8,128], index: 2, kind: input, shape index: {}]   ;;  %s987_s3 = inlined_call_operand.vmem [shape: f32[16,128], index: 3, kind: output, shape index: {}]  }
   0x1   :  { %s16_s13 = sshll.u32 %s879_s12, 4  ;;  %s17_s13 = int_to_ptr.vmem [resolvable:$true] %s16_s13 }
   0x2   :  { %s865_s14 = scalar_lea.vmem %s17_s13, 5120  ;;  %p870_p1 = scmp.lt.s32.totalorder %s17_s13, %s17_s13 }
   0x3   :  { %p866_p0 = scmp.ne.s32.totalorder %s17_s13, %s865_s14  ;;  %p871_p2 = scmp.lt.s32.totalorder %s865_s14, %s865_s14 }
   0x5   :  { %p872_p3 = por %p871_p2, %p870_p1 }
   0x7   :  { %p873_p4 = pnand %p872_p3, %p866_p0 }
   0x9   :  { %876 = shalt.err (!%p873_p4)
}
   0xa   :  { %s880_s15 = smov 320   ;;  %s881_s16 = smov 20  }
   0xb   :  { %22 = dma.hbm_to_vmem [thread:$0]  %s985_s1, 5120, %s17_s13, [#allocation3], %s880_s15, %s880_s15, %s881_s16  }
   0xc   :  { %877 = dma.done.wait [#allocation3], 5120  }
   0xd   :  { %878 = vsyncadd [#allocation3], 4294962176  ;;  %v882_v0 = vmov 0.0   ;;  %vm883_vm0 = vmmov 0   ;;  %v812_v1 = vld [vmem:[#allocation2 + $0x118] ss:$20 sps:$4 sm:$0xff]  }
   0xe   :  { %707 = vmatprep.subr.bf16.mxu0 %v882_v0  ;;  %723 = vmatprep.mubr.msk.bf16.mxu0 %vm883_vm0, %v882_v0  ;;  %v813_v2 = vld [vmem:[#allocation2 + $0xf0] ss:$20 sps:$4 sm:$0xff]   ;;  %v814_v3 = vld [vmem:[#allocation2 + $0xc8] ss:$20 sps:$4 sm:$0xff]   ;;  %v815_v5 = vld [vmem:[#allocation2 + $0xa0] ss:$20 sps:$4 sm:$0xff]  }
   0xf   :  { %727 = vmatprep.subr.bf16.mxu1 %v882_v0  ;;  %743 = vmatprep.mubr.msk.bf16.mxu1 %vm883_vm0, %v882_v0  ;;  %v821_v4 = vld [vmem:[#allocation2 + $0x11c] ss:$20 sps:$4 sm:$0xff]   ;;  %v822_v6 = vld [vmem:[#allocation2 + $0xf4] ss:$20 sps:$4 sm:$0xff]   ;;  %v816_v7 = vld [vmem:[#allocation2 + $0x78] ss:$20 sps:$4 sm:$0xff]  }
  0x10   :  { %708 = vmatpush3.bf16.msra.mxu0 %v812_v1  ;;  %728 = vmatpush3.bf16.msra.mxu1 %v821_v4  ;;  %v823_v8 = vld [vmem:[#allocation2 + $0xcc] ss:$20 sps:$4 sm:$0xff]   ;;  %v817_v9 = vld [vmem:[#allocation2 + $0x50] ss:$20 sps:$4 sm:$0xff]   ;;  %v818_v11 = vld [vmem:[#allocation2 + $0x28] ss:$20 sps:$4 sm:$0xff]  }
  0x11   :  { %709 = vmatprep.subr.bf16.mxu0 %v882_v0  ;;  %729 = vmatprep.subr.bf16.mxu1 %v882_v0  ;;  %v824_v10 = vld [vmem:[#allocation2 + $0xa4] ss:$20 sps:$4 sm:$0xff]   ;;  %v825_v12 = vld [vmem:[#allocation2 + $0x7c] ss:$20 sps:$4 sm:$0xff]   ;;  %v819_v13 = vld [vmem:[#allocation2] ss:$20 sps:$4 sm:$0xff]  }
  0x12   :  { %v820_v14 = vld [vmem:[%s984_s0] sm:$0xff]   ;;  %v826_v15 = vld [vmem:[#allocation2 + $0x54] ss:$20 sps:$4 sm:$0xff]   ;;  %v830_v19 = vld [vmem:[#allocation2 + $0xf8] ss:$20 sps:$4 sm:$0xff]  }
  0x13   :  { %v827_v16 = vld [vmem:[#allocation2 + $0x2c] ss:$20 sps:$4 sm:$0xff]   ;;  %v828_v17 = vld [vmem:[#allocation2 + $0x4] ss:$20 sps:$4 sm:$0xff]   ;;  %v832_v21 = vld [vmem:[#allocation2 + $0xa8] ss:$20 sps:$4 sm:$0xff]  }
  0x14   :  { %710 = vmatpush3.bf16.msra.mxu0 %v813_v2  ;;  %730 = vmatpush3.bf16.msra.mxu1 %v822_v6  ;;  %v829_v18 = vld [vmem:[#allocation2 + $0x120] ss:$20 sps:$4 sm:$0xff]   ;;  %v831_v20 = vld [vmem:[#allocation2 + $0xd0] ss:$20 sps:$4 sm:$0xff]   ;;  %v834_v33 = vld [vmem:[#allocation2 + $0x58] ss:$20 sps:$4 sm:$0xff]  }
  0x15   :  { %711 = vmatprep.subr.bf16.mxu0 %v882_v0  ;;  %731 = vmatprep.subr.bf16.mxu1 %v882_v0  ;;  %v833_v22 = vld [vmem:[#allocation2 + $0x80] ss:$20 sps:$4 sm:$0xff]   ;;  %v835_v34 = vld [vmem:[#allocation2 + $0x30] ss:$20 sps:$4 sm:$0xff]   ;;  %v836_v35 = vld [vmem:[#allocation2 + $0x8] ss:$20 sps:$4 sm:$0xff]  }
  0x16   :  { %v615_v23 = vld [vmem:[%s986_s2] ss:$0 sm:$0xff]  ;;  %v837_v36 = vld [vmem:[#allocation2 + $0x124] ss:$20 sps:$4 sm:$0xff]   ;;  %v838_v37 = vld [vmem:[#allocation2 + $0xfc] ss:$20 sps:$4 sm:$0xff]  }
  0x17   :  { %v839_v38 = vld [vmem:[#allocation2 + $0xd4] ss:$20 sps:$4 sm:$0xff]   ;;  %v840_v39 = vld [vmem:[#allocation2 + $0xac] ss:$20 sps:$4 sm:$0xff]   ;;  %v841_v40 = vld [vmem:[#allocation2 + $0x84] ss:$20 sps:$4 sm:$0xff]  }
  0x18   :  { %712 = vmatpush3.bf16.msra.mxu0 %v814_v3  ;;  %732 = vmatpush3.bf16.msra.mxu1 %v823_v8  ;;  %v625_v41 = vld [vmem:[%s986_s2 + $0x1] ss:$0 sm:$0xff]  ;;  %v842_v51 = vld [vmem:[#allocation2 + $0x5c] ss:$20 sps:$4 sm:$0xff]   ;;  %v843_v52 = vld [vmem:[#allocation2 + $0x34] ss:$20 sps:$4 sm:$0xff]  }
  0x19   :  { %713 = vmatprep.subr.bf16.mxu0 %v882_v0  ;;  %733 = vmatprep.subr.bf16.mxu1 %v882_v0  ;;  %v844_v53 = vld [vmem:[#allocation2 + $0xc] ss:$20 sps:$4 sm:$0xff]   ;;  %v845_v54 = vld [vmem:[#allocation2 + $0x128] ss:$20 sps:$4 sm:$0xff]   ;;  %v848_v57 = vld [vmem:[#allocation2 + $0xb0] ss:$20 sps:$4 sm:$0xff]  }
  0x1a   :  { %v846_v55 = vld [vmem:[#allocation2 + $0x100] ss:$20 sps:$4 sm:$0xff]   ;;  %v847_v56 = vld [vmem:[#allocation2 + $0xd8] ss:$20 sps:$4 sm:$0xff]   ;;  %v849_v58 = vld [vmem:[#allocation2 + $0x88] ss:$20 sps:$4 sm:$0xff]  }
  0x1b   :  { %v634_v59 = vld [vmem:[%s986_s2 + $0x2] ss:$0 sm:$0xff]  ;;  %v852_v8 = vld [vmem:[#allocation2 + $0x10] ss:$20 sps:$4 sm:$0xff]  }
  0x1c   :  { %714 = vmatpush3.bf16.msra.mxu0 %v815_v5  ;;  %734 = vmatpush3.bf16.msra.mxu1 %v824_v10  ;;  %v850_v6 = vld [vmem:[#allocation2 + $0x60] ss:$20 sps:$4 sm:$0xff]  }
  0x1d   :  { %715 = vmatprep.subr.bf16.mxu0 %v882_v0  ;;  %735 = vmatprep.subr.bf16.mxu1 %v882_v0 }
  0x20   :  { %716 = vmatpush3.bf16.msra.mxu0 %v816_v7  ;;  %736 = vmatpush3.bf16.msra.mxu1 %v825_v12  ;;  %v851_v7 = vld [vmem:[#allocation2 + $0x38] ss:$20 sps:$4 sm:$0xff]  }
  0x21   :  { %717 = vmatprep.subr.bf16.mxu0 %v882_v0  ;;  %737 = vmatprep.subr.bf16.mxu1 %v882_v0 }
  0x24   :  { %718 = vmatpush3.bf16.msra.mxu0 %v817_v9  ;;  %738 = vmatpush3.bf16.msra.mxu1 %v826_v15  ;;  %v643_v9 = vld [vmem:[%s986_s2 + $0x3] ss:$0 sm:$0xff] }
  0x25   :  { %719 = vmatprep.subr.bf16.mxu0 %v882_v0  ;;  %739 = vmatprep.subr.bf16.mxu1 %v882_v0 }
  0x28   :  { %720 = vmatpush3.bf16.msra.mxu0 %v818_v11  ;;  %740 = vmatpush3.bf16.msra.mxu1 %v827_v16 }
  0x29   :  { %721 = vmatprep.subr.bf16.mxu0 %v882_v0  ;;  %741 = vmatprep.subr.bf16.mxu1 %v882_v0 }
  0x2c   :  { %722 = vmatpush3.bf16.msra.mxu0 %v819_v13  ;;  %742 = vmatpush3.bf16.msra.mxu1 %v828_v17 }
  0x2d   :  { %747 = vmatprep.subr.bf16.mxu0 %v882_v0  ;;  %767 = vmatprep.subr.bf16.mxu1 %v882_v0 }
  0x2f   :  { %724 = vmatmul.mubr.bf16.vlgmr.msra.gmra.mxu0 %v820_v14 }
  0x30   :  { %763 = vmatprep.mubr.msk.bf16.mxu0 %vm883_vm0, %v882_v0  ;;  %748 = vmatpush3.bf16.msra.mxu0 %v829_v18 }
  0x31   :  { %749 = vmatprep.subr.bf16.mxu0 %v882_v0 }
  0x34   :  { %750 = vmatpush3.bf16.msra.mxu0 %v830_v19 }
  0x35   :  { %751 = vmatprep.subr.bf16.mxu0 %v882_v0 }
  0x38   :  { %752 = vmatpush3.bf16.msra.mxu0 %v831_v20 }
  0x39   :  { %753 = vmatprep.subr.bf16.mxu0 %v882_v0 }
  0x3c   :  { %754 = vmatpush3.bf16.msra.mxu0 %v832_v21 }
  0x3d   :  { %755 = vmatprep.subr.bf16.mxu0 %v882_v0 }
  0x40   :  { %756 = vmatpush3.bf16.msra.mxu0 %v833_v22 }
  0x41   :  { %757 = vmatprep.subr.bf16.mxu0 %v882_v0 }
  0x44   :  { %758 = vmatpush3.bf16.msra.mxu0 %v834_v33 }
  0x45   :  { %759 = vmatprep.subr.bf16.mxu0 %v882_v0 }
  0x48   :  { %760 = vmatpush3.bf16.msra.mxu0 %v835_v34 }
  0x49   :  { %761 = vmatprep.subr.bf16.mxu0 %v882_v0 }
  0x4c   :  { %762 = vmatpush3.bf16.msra.mxu0 %v836_v35 }
  0x4d   :  { %787 = vmatprep.subr.bf16.mxu0 %v882_v0 }
  0xef   :  { %v140_v24 = vpop.f32.mrf.mxu0 }
  0xf0   :  { %v141_v26 = vadd.f32 %v615_v23, %v140_v24 }
  0xf1   :  { %v725_v25 = vpop.f32.mrf.mxu0 }
  0xf2   :  { %v147_v30 = vmax.f32 %v141_v26, 0.0  ;;  %v661_v25 = vld [vmem:[%s986_s2 + $0x5] ss:$0 sm:$0xff] }
  0xf3   :  { %v143_v27 = vpop.f32.mrf.mxu0 }
  0xf4   :  { %v144_v28 = vadd.f32 %v615_v23, %v143_v27 }
  0xf5   :  { %v726_v29 = vpop.f32.mrf.mxu0 }
  0xf6   :  { %v148_v31 = vmax.f32 %v144_v28, 0.0 }
  0xf8   :  { %v165_v32 = vpack.c.bf16 %v148_v31, %v147_v30 }
  0xfa   :  { %744 = vmatmul.mubr.bf16.vlgmr.msra.gmra.mxu1 %v165_v32 }
  0xfb   :  { %783 = vmatprep.mubr.msk.bf16.mxu1 %vm883_vm0, %v882_v0  ;;  %768 = vmatpush3.bf16.msra.mxu1 %v837_v36 }
  0xfc   :  { %769 = vmatprep.subr.bf16.mxu1 %v882_v0 }
  0xff   :  { %770 = vmatpush3.bf16.msra.mxu1 %v838_v37 }
 0x100   :  { %771 = vmatprep.subr.bf16.mxu1 %v882_v0 }
 0x103   :  { %772 = vmatpush3.bf16.msra.mxu1 %v839_v38 }
 0x104   :  { %773 = vmatprep.subr.bf16.mxu1 %v882_v0 }
 0x107   :  { %774 = vmatpush3.bf16.msra.mxu1 %v840_v39 }
 0x108   :  { %775 = vmatprep.subr.bf16.mxu1 %v882_v0 }
 0x10b   :  { %776 = vmatpush3.bf16.msra.mxu1 %v841_v40 }
 0x10c   :  { %777 = vmatprep.subr.bf16.mxu1 %v882_v0 }
 0x10f   :  { %778 = vmatpush3.bf16.msra.mxu1 %v842_v51 }
 0x110   :  { %779 = vmatprep.subr.bf16.mxu1 %v882_v0 }
 0x113   :  { %780 = vmatpush3.bf16.msra.mxu1 %v843_v52 }
 0x114   :  { %781 = vmatprep.subr.bf16.mxu1 %v882_v0 }
 0x117   :  { %782 = vmatpush3.bf16.msra.mxu1 %v844_v53 }
 0x1ba   :  { %v253_v42 = vpop.f32.mrf.mxu1 }
 0x1bb   :  { %v254_v44 = vadd.f32 %v625_v41, %v253_v42 }
 0x1bc   :  { %v745_v43 = vpop.f32.mrf.mxu1 }
 0x1bd   :  { %v260_v48 = vmax.f32 %v254_v44, 0.0 }
 0x1be   :  { %v256_v45 = vpop.f32.mrf.mxu1 }
 0x1bf   :  { %v257_v46 = vadd.f32 %v625_v41, %v256_v45 }
 0x1c0   :  { %v746_v47 = vpop.f32.mrf.mxu1 }
 0x1c1   :  { %v261_v49 = vmax.f32 %v257_v46, 0.0 }
 0x1c3   :  { %v278_v50 = vpack.c.bf16 %v261_v49, %v260_v48 }
 0x1c5   :  { %764 = vmatmul.mubr.bf16.vlgmr.msra.gmra.mxu0 %v278_v50 }
 0x1c6   :  { %803 = vmatprep.mubr.msk.bf16.mxu0 %vm883_vm0, %v882_v0  ;;  %788 = vmatpush3.bf16.msra.mxu0 %v845_v54 }
 0x1c7   :  { %789 = vmatprep.subr.bf16.mxu0 %v882_v0 }
 0x1ca   :  { %790 = vmatpush3.bf16.msra.mxu0 %v846_v55 }
 0x1cb   :  { %791 = vmatprep.subr.bf16.mxu0 %v882_v0 }
 0x1ce   :  { %792 = vmatpush3.bf16.msra.mxu0 %v847_v56 }
 0x1cf   :  { %793 = vmatprep.subr.bf16.mxu0 %v882_v0 }
 0x1d2   :  { %794 = vmatpush3.bf16.msra.mxu0 %v848_v57 }
 0x1d3   :  { %795 = vmatprep.subr.bf16.mxu0 %v882_v0 }
 0x1d6   :  { %796 = vmatpush3.bf16.msra.mxu0 %v849_v58 }
 0x1d7   :  { %797 = vmatprep.subr.bf16.mxu0 %v882_v0 }
 0x1da   :  { %798 = vmatpush3.bf16.msra.mxu0 %v850_v6 }
 0x1db   :  { %799 = vmatprep.subr.bf16.mxu0 %v882_v0 }
 0x1de   :  { %800 = vmatpush3.bf16.msra.mxu0 %v851_v7 }
 0x1df   :  { %801 = vmatprep.subr.bf16.mxu0 %v882_v0  ;;  %v652_v0 = vld [vmem:[%s986_s2 + $0x4] ss:$0 sm:$0xff] }
 0x1e2   :  { %802 = vmatpush3.bf16.msra.mxu0 %v852_v8 }
 0x285   :  { %v366_v60 = vpop.f32.mrf.mxu0 }
 0x286   :  { %v367_v62 = vadd.f32 %v634_v59, %v366_v60 }
 0x287   :  { %v765_v61 = vpop.f32.mrf.mxu0 }
 0x288   :  { %v373_v3 = vmax.f32 %v367_v62, 0.0 }
 0x289   :  { %v369_v63 = vpop.f32.mrf.mxu0 }
 0x28a   :  { %v370_v1 = vadd.f32 %v634_v59, %v369_v63 }
 0x28b   :  { %v766_v2 = vpop.f32.mrf.mxu0 }
 0x28c   :  { %v374_v4 = vmax.f32 %v370_v1, 0.0 }
 0x28e   :  { %v391_v5 = vpack.c.bf16 %v374_v4, %v373_v3 }
 0x290   :  { %784 = vmatmul.mubr.bf16.vlgmr.msra.gmra.mxu1 %v391_v5 }
 0x350   :  { %v479_v10 = vpop.f32.mrf.mxu1 }
 0x351   :  { %v480_v12 = vadd.f32 %v643_v9, %v479_v10 }
 0x352   :  { %v785_v11 = vpop.f32.mrf.mxu1 }
 0x353   :  { %v486_v16 = vmax.f32 %v480_v12, 0.0 }
 0x354   :  { %v482_v13 = vpop.f32.mrf.mxu1 }
 0x355   :  { %v483_v14 = vadd.f32 %v643_v9, %v482_v13 }
 0x356   :  { %v786_v15 = vpop.f32.mrf.mxu1 }
 0x357   :  { %v487_v17 = vmax.f32 %v483_v14, 0.0 }
 0x359   :  { %v504_v18 = vpack.c.bf16 %v487_v17, %v486_v16 }
 0x35b   :  { %804 = vmatmul.mubr.bf16.vlgmr.msra.gmra.mxu0 %v504_v18 }
 0x41b   :  { %v592_v19 = vpop.f32.mrf.mxu0 }
 0x41c   :  { %v593_v20 = vadd.f32 %v652_v0, %v592_v19 }
 0x41d   :  { %v805_v21 = vpop.f32.mrf.mxu0 }
 0x41e   :  { %853 = vtanh.f32 %v593_v20 }
 0x41f   :  { %v595_v22 = vpop.f32.mrf.mxu0 }
 0x420   :  { %v596_v23 = vadd.f32 %v652_v0, %v595_v22 }
 0x421   :  { %v806_v24 = vpop.f32.mrf.mxu0 }
 0x422   :  { %855 = vtanh.f32 %v596_v23 }
 0x42b   :  { %v854_v26 = vpop.eup %853 }
 0x42c   :  { %v606_v27 = vmul.f32 %v854_v26, %v661_v25 }
 0x42e   :  { %608 = vst [vmem:[%s987_s3] sm:$0xff] %v606_v27 }
 0x42f   :  { %v856_v28 = vpop.eup %855 }
 0x430   :  { %v607_v29 = vmul.f32 %v856_v28, %v661_v25 }
 0x432   :  { %609 = vst [vmem:[%s987_s3 + $0x8] sm:$0xff] %v607_v29 }
 0x433   :  { %614 = vsyncpa [#allocation3], 1 }

</bundles_post_ra>
